<compile_context>
chip_gen: v6e
topology: v6e:2x2x1
jax: 0.10.0
libtpu: 0.0.40
codegen_flags: <defaults>
</compile_context>

<pallas_src>
from functools import partial

import jax
import jax.numpy as jnp
import numpy as np
from jax.experimental import pallas as pl
from jax.experimental.pallas import tpu as pltpu

LANE = 128
SUBLANE = 8


# ---------------------------------------------------------------------------
# Fused kernel: accumulate relu(x @ W_eff_slice + b_eff_slice) @ W2_slice over
# hidden-dim slices; add b2 and store once on the last grid step.
# ---------------------------------------------------------------------------
def _aux_fc_kernel(x_ref, w1_ref, b1_ref, w2_ref, b2_ref, o_ref, acc_ref):
    # x_ref : (N_pad, K_pad)      f32   activations (same block every step)
    # w1_ref: (K_pad, TH)         bf16  hidden-dim slice of folded fc1 weight
    # b1_ref: (1, TH)             f32   matching slice of folded fc1 bias
    # w2_ref: (TH, NOUT_PAD)      bf16  matching row-slice of lane-padded fc2 w
    # b2_ref: (1, NOUT_PAD)       f32   lane-padded fc2 bias
    # o_ref : (N_pad, NOUT_PAD)   f32   final output (written on last step)
    # acc_ref: (N_pad, NOUT_PAD)  f32   VMEM accumulator scratch
    j = pl.program_id(0)

    @pl.when(j == 0)
    def _():
        acc_ref[...] = jnp.zeros_like(acc_ref)

    x = x_ref[...].astype(w1_ref.dtype)  # f32 -> bf16 VPU cast, hidden under DMA
    h = jnp.dot(x, w1_ref[...], preferred_element_type=jnp.float32)
    h = jnp.maximum(h + b1_ref[...], 0.0)
    # TODO(synk): nn.Dropout() implemented as eval-mode identity (training-mode
    # mask would need pltpu.prng_seed / pltpu.prng_random_bits).
    acc_ref[...] += jnp.dot(
        h, w2_ref[...].astype(jnp.float32), preferred_element_type=jnp.float32
    )

    @pl.when(j == pl.num_programs(0) - 1)
    def _():
        o_ref[...] = acc_ref[...] + b2_ref[...]


# ---------------------------------------------------------------------------
# One-time weight preprocessing (outside the per-step forward)
# ---------------------------------------------------------------------------
def fold_params(params, weight_dtype=jnp.bfloat16, k_align=256):
    """Fold the 1x1 conv into fc1; pre-transpose / pre-pad to kernel layouts."""
    conv_w, conv_b = params["conv_w"], params["conv_b"]    # (128, C_in), (128,)
    fc1_w, fc1_b = params["fc1_w"], params["fc1_b"]        # (1024, 128*H*W), (1024,)
    fc2_w, fc2_b = params["fc2_w"], params["fc2_b"]        # (n_out, 1024), (n_out,)

    c_conv, c_in = conv_w.shape
    h1, k_full = fc1_w.shape
    n_out = fc2_w.shape[0]
    pix = k_full // c_conv                                  # H*W

    w1_r = fc1_w.reshape(h1, c_conv, pix)                   # [j, o, p]
    # W_eff[j, c, p] = sum_o fc1_w[j, (o,p)] * conv_w[o, c]
    w_eff = jnp.einsum("jop,oc->jcp", w1_r, conv_w, precision="highest")
    b_eff = fc1_b + jnp.einsum("jop,o->j", w1_r, conv_b, precision="highest")

    # Contraction dim padded to a multiple of 256 (full MXU tiles, aligned DMA).
    k = c_in * pix
    k_pad = max(k_align, ((k + k_align - 1) // k_align) * k_align)
    w1 = (
        jnp.zeros((k_pad, h1), weight_dtype)
        .at[:k, :]
        .set(w_eff.reshape(h1, k).T.astype(weight_dtype))
    )

    # fc2 weight / bias padded to a lane-dense 128-wide output slab.
    n_out_pad = max(LANE, ((n_out + LANE - 1) // LANE) * LANE)
    w2 = (
        jnp.zeros((h1, n_out_pad), weight_dtype)
        .at[:, :n_out]
        .set(fc2_w.T.astype(weight_dtype))
    )
    b2p = (
        jnp.zeros((1, n_out_pad), jnp.float32)
        .at[0, :n_out]
        .set(fc2_b.astype(jnp.float32))
    )

    return {
        "w1": w1,                                            # (K_pad, H1)  bf16
        "b1": b_eff.reshape(1, h1).astype(jnp.float32),      # (1, H1)      f32
        "w2": w2,                                            # (H1, NOUT_PAD) bf16
        "b2p": b2p,                                          # (1, NOUT_PAD) f32
        "b2": fc2_b.astype(jnp.float32),                     # (n_out,) kept for shape
    }


def _pick_th(k_pad, h1, n_out_pad=LANE, vmem_budget_bytes=24 << 20):
    """Largest hidden-dim tile whose double-buffered bf16 weight slices fit the
    VMEM budget (safe for v7x's 64 MiB physical / 32 MiB default scoped VMEM and
    v5e's 16 MiB default scoped VMEM at CIFAR-scale K)."""
    th = h1
    while th > 2 * LANE:
        per_step = 2 * (k_pad * th * 2 + th * n_out_pad * 2)  # double-buffered bf16
        if per_step <= vmem_budget_bytes:
            break
        th //= 2
    return th


# ---------------------------------------------------------------------------
# Forward wrapper (jitted so the reshape/pad/slice fuse around the kernel)
# ---------------------------------------------------------------------------
@partial(jax.jit, static_argnames=("th",))
def inception_aux_forward(x_nchw, folded, *, th=None):
    n = x_nchw.shape[0]
    k_pad, h1 = folded["w1"].shape
    n_out_pad = folded["w2"].shape[1]
    n_out = folded["b2"].shape[0]

    if th is None:
        th = _pick_th(k_pad, h1, n_out_pad)
    assert h1 % th == 0 and th % LANE == 0
    num_blocks = h1 // th

    # PyTorch x.view(N, -1) of the (virtual) NCHW conv output maps, after the
    # fold, to a plain NCHW flatten of the *input* -- no transpose needed.
    x_flat = x_nchw.reshape(n, -1)                                    # (N, K) f32
    k = x_flat.shape[1]
    assert k <= k_pad

    # Pad N up to the sublane tile and K up to the pre-padded weight K so every
    # tile is full (unmasked loads/stores); padded rows/cols are zeros.
    n_pad = max(SUBLANE, ((n + SUBLANE - 1) // SUBLANE) * SUBLANE)
    x_pad = jnp.zeros((n_pad, k_pad), x_flat.dtype).at[:n, :k].set(x_flat)

    out = pl.pallas_call(
        _aux_fc_kernel,
        out_shape=jax.ShapeDtypeStruct((n_pad, n_out_pad), jnp.float32),
        grid_spec=pltpu.PrefetchScalarGridSpec(
            num_scalar_prefetch=0,
            grid=(num_blocks,),
            in_specs=[
                pl.BlockSpec((n_pad, k_pad), lambda j: (0, 0)),        # x (full)
                pl.BlockSpec((k_pad, th), lambda j: (0, j)),           # W_eff slice
                pl.BlockSpec((1, th), lambda j: (0, j)),               # b_eff slice
                pl.BlockSpec((th, n_out_pad), lambda j: (j, 0)),       # fc2 slice
                pl.BlockSpec((1, n_out_pad), lambda j: (0, 0)),        # fc2 bias
            ],
            out_specs=pl.BlockSpec((n_pad, n_out_pad), lambda j: (0, 0)),
            scratch_shapes=[pltpu.VMEM((n_pad, n_out_pad), jnp.float32)],
        ),
        compiler_params=pltpu.CompilerParams(
            # Hidden-dim axis is a reduction into the VMEM accumulator.
            dimension_semantics=("arbitrary",),
        ),
    )(x_pad, folded["w1"], folded["b1"], folded["w2"], folded["b2p"])

    # Drop batch padding rows and lane-padding columns (fused by XLA under jit).
    return out[:n, :n_out]


# ---------------------------------------------------------------------------
# Parameter init + pure-JAX f32 reference of the PyTorch module (eval mode)
# ---------------------------------------------------------------------------
def init_params(key, c_in, hw, n_outputs, dtype=jnp.float32):
    k1, k2, k3, k4, k5, k6 = jax.random.split(key, 6)
    c_conv = 128
    k_flat = c_conv * hw * hw

    def u(k, shape, fan_in):
        s = 1.0 / np.sqrt(fan_in)
        return jax.random.uniform(k, shape, dtype, -s, s)

    return {
        "conv_w": u(k1, (c_conv, c_in), c_in),
        "conv_b": u(k2, (c_conv,), c_in),
        "fc1_w": u(k3, (1024, k_flat), k_flat),
        "fc1_b": u(k4, (1024,), k_flat),
        "fc2_w": u(k5, (n_outputs, 1024), 1024),
        "fc2_b": u(k6, (n_outputs,), 1024),
    }


def reference_forward(x_nchw, p):
    n = x_nchw.shape[0]
    y = jnp.einsum("nchw,oc->nohw", x_nchw, p["conv_w"], precision="highest")
    y = y + p["conv_b"][None, :, None, None]
    y = y.reshape(n, -1)
    h = jnp.maximum(jnp.dot(y, p["fc1_w"].T, precision="highest") + p["fc1_b"], 0.0)
    return jnp.dot(h, p["fc2_w"].T, precision="highest") + p["fc2_b"]


if __name__ == "__main__":
    key = jax.random.PRNGKey(0)
    kx, kp = jax.random.split(key)

    # Small CIFAR-like aux-head shapes. C_in=3, HW=8 -> K = 192 (exercises the
    # K->256 padding path); N=2 exercises the batch->8 sublane padding path.
    N, C_in, HW, n_outputs = 2, 3, 8, 10
    x = jax.random.normal(kx, (N, C_in, HW, HW), dtype=jnp.float32)
    params = init_params(kp, C_in, HW, n_outputs)

    folded = fold_params(params)                 # one-time weight preprocessing
    out = jax.block_until_ready(inception_aux_forward(x, folded))

    ref = reference_forward(x, params)
    # bf16 weights (and bf16 x cast) on the kernel path -> compare to the f32
    # reference with a tolerance covering bf16 quantization.
    np.testing.assert_allclose(np.asarray(out), np.asarray(ref), rtol=2e-2, atol=2e-2)

    assert out.shape == (N, n_outputs)
    print("KERNEL_OK")
</pallas_src>

<mosaic_0001>
module attributes {stable_mosaic.version = 11 : i64} {
  func.func @_aux_fc_kernel(%arg0: i32, %arg1: memref<8x256xf32, #tpu.memory_space<vmem>>, %arg2: memref<256x1024xbf16, #tpu.memory_space<vmem>>, %arg3: memref<1x1024xf32, #tpu.memory_space<vmem>>, %arg4: memref<1024x128xbf16, #tpu.memory_space<vmem>>, %arg5: memref<1x128xf32, #tpu.memory_space<vmem>>, %arg6: memref<8x128xf32, #tpu.memory_space<vmem>>, %arg7: memref<8x128xf32, #tpu.memory_space<vmem>>) attributes {dimension_semantics = [#tpu.dimension_semantics<arbitrary>], iteration_bounds = array<i64: 1>, scalar_prefetch = 0 : i64, scratch_operands = 1 : i64, tpu.core_type = #tpu.core_type<tc>, window_params = [{pipeline_mode = #tpu.pipeline_mode<synchronous>, transform_indices = @transform_0, window_bounds = array<i64: 8, 256>}, {transform_indices = @transform_1, window_bounds = array<i64: 256, 1024>}, {transform_indices = @transform_2, window_bounds = array<i64: 1, 1024>}, {transform_indices = @transform_3, window_bounds = array<i64: 1024, 128>}, {pipeline_mode = #tpu.pipeline_mode<synchronous>, transform_indices = @transform_4, window_bounds = array<i64: 1, 128>}, {pipeline_mode = #tpu.pipeline_mode<synchronous>, transform_indices = @transform_5, window_bounds = array<i64: 8, 128>}]} {
    %c0_i32 = arith.constant 0 : i32
    %0 = arith.cmpi eq, %arg0, %c0_i32 : i32
    %1 = arith.extui %0 : i1 to i32
    %c0_i32_0 = arith.constant 0 : i32
    %2 = arith.cmpi ne, %1, %c0_i32_0 : i32
    scf.if %2 {
      %cst_16 = arith.constant 0.000000e+00 : f32
      %21 = vector.broadcast %cst_16 : f32 to vector<8x128xf32>
      %c0_17 = arith.constant 0 : index
      %c0_18 = arith.constant 0 : index
      %22 = vector.load %arg7[%c0_17, %c0_18] : memref<8x128xf32, #tpu.memory_space<vmem>>, vector<8x128xf32>
      tpu.vector_store %arg7[%c0_17, %c0_18], %21 {strides = array<i32>} : memref<8x128xf32, #tpu.memory_space<vmem>>, vector<8x128xf32>,
    } else {
    }
    %c0 = arith.constant 0 : index
    %c0_1 = arith.constant 0 : index
    %3 = vector.load %arg1[%c0, %c0_1] : memref<8x256xf32, #tpu.memory_space<vmem>>, vector<8x256xf32>
    %4 = arith.truncf %3 : vector<8x256xf32> to vector<8x256xbf16>
    %c0_2 = arith.constant 0 : index
    %c0_3 = arith.constant 0 : index
    %5 = vector.load %arg2[%c0_2, %c0_3] : memref<256x1024xbf16, #tpu.memory_space<vmem>>, vector<256x1024xbf16>
    %cst = arith.constant dense<0.000000e+00> : vector<8x1024xf32>
    %6 = tpu.matmul %4, %5, %cst {dimension_numbers = #tpu.dot_dimension_numbers<[1], [0], [0], [1], [0, 0, 1, 1], [], []>} : vector<8x256xbf16>, vector<256x1024xbf16>, vector<8x1024xf32> -> vector<8x1024xf32>
    %c0_4 = arith.constant 0 : index
    %c0_5 = arith.constant 0 : index
    %7 = vector.load %arg3[%c0_4, %c0_5] : memref<1x1024xf32, #tpu.memory_space<vmem>>, vector<1x1024xf32>
    %8 = vector.broadcast %7 : vector<1x1024xf32> to vector<8x1024xf32>
    %9 = arith.addf %6, %8 : vector<8x1024xf32>
    %cst_6 = arith.constant 0.000000e+00 : f32
    %10 = vector.broadcast %cst_6 : f32 to vector<8x1024xf32>
    %11 = arith.maximumf %9, %10 : vector<8x1024xf32>
    %c0_7 = arith.constant 0 : index
    %c0_8 = arith.constant 0 : index
    %12 = vector.load %arg7[%c0_7, %c0_8] : memref<8x128xf32, #tpu.memory_space<vmem>>, vector<8x128xf32>
    %c0_9 = arith.constant 0 : index
    %c0_10 = arith.constant 0 : index
    %13 = vector.load %arg4[%c0_9, %c0_10] : memref<1024x128xbf16, #tpu.memory_space<vmem>>, vector<1024x128xbf16>
    %14 = arith.extf %13 : vector<1024x128xbf16> to vector<1024x128xf32>
    %cst_11 = arith.constant dense<0.000000e+00> : vector<8x128xf32>
    %15 = tpu.matmul %11, %14, %cst_11 {dimension_numbers = #tpu.dot_dimension_numbers<[1], [0], [0], [1], [0, 0, 1, 1], [], []>} : vector<8x1024xf32>, vector<1024x128xf32>, vector<8x128xf32> -> vector<8x128xf32>
    %16 = arith.addf %12, %15 : vector<8x128xf32>
    %c0_12 = arith.constant 0 : index
    %c0_13 = arith.constant 0 : index
    %17 = vector.load %arg7[%c0_12, %c0_13] : memref<8x128xf32, #tpu.memory_space<vmem>>, vector<8x128xf32>
    tpu.vector_store %arg7[%c0_12, %c0_13], %16 {strides = array<i32>} : memref<8x128xf32, #tpu.memory_space<vmem>>, vector<8x128xf32>,
    %c0_i32_14 = arith.constant 0 : i32
    %18 = arith.cmpi eq, %arg0, %c0_i32_14 : i32
    %19 = arith.extui %18 : i1 to i32
    %c0_i32_15 = arith.constant 0 : i32
    %20 = arith.cmpi ne, %19, %c0_i32_15 : i32
    scf.if %20 {
      %c0_16 = arith.constant 0 : index
      %c0_17 = arith.constant 0 : index
      %21 = vector.load %arg7[%c0_16, %c0_17] : memref<8x128xf32, #tpu.memory_space<vmem>>, vector<8x128xf32>
      %c0_18 = arith.constant 0 : index
      %c0_19 = arith.constant 0 : index
      %22 = vector.load %arg5[%c0_18, %c0_19] : memref<1x128xf32, #tpu.memory_space<vmem>>, vector<1x128xf32>
      %23 = vector.broadcast %22 : vector<1x128xf32> to vector<8x128xf32>
      %24 = arith.addf %21, %23 : vector<8x128xf32>
      %c0_20 = arith.constant 0 : index
      %c0_21 = arith.constant 0 : index
      %25 = vector.load %arg6[%c0_20, %c0_21] : memref<8x128xf32, #tpu.memory_space<vmem>>, vector<8x128xf32>
      tpu.vector_store %arg6[%c0_20, %c0_21], %24 {strides = array<i32>} : memref<8x128xf32, #tpu.memory_space<vmem>>, vector<8x128xf32>,
    } else {
    }
    return
  }
  func.func @transform_0(%arg0: i32) -> (i32, i32) {
    %c0_i32 = arith.constant 0 : i32
    %c0_i32_0 = arith.constant 0 : i32
    %c0_i32_1 = arith.constant 0 : i32
    return %c0_i32, %c0_i32_0 : i32, i32
  }
  func.func @transform_1(%arg0: i32) -> (i32, i32) {
    %c0_i32 = arith.constant 0 : i32
    %c0_i32_0 = arith.constant 0 : i32
    return %c0_i32, %arg0 : i32, i32
  }
  func.func @transform_2(%arg0: i32) -> (i32, i32) {
    %c0_i32 = arith.constant 0 : i32
    %c0_i32_0 = arith.constant 0 : i32
    return %c0_i32, %arg0 : i32, i32
  }
  func.func @transform_3(%arg0: i32) -> (i32, i32) {
    %c0_i32 = arith.constant 0 : i32
    %c0_i32_0 = arith.constant 0 : i32
    return %arg0, %c0_i32 : i32, i32
  }
  func.func @transform_4(%arg0: i32) -> (i32, i32) {
    %c0_i32 = arith.constant 0 : i32
    %c0_i32_0 = arith.constant 0 : i32
    %c0_i32_1 = arith.constant 0 : i32
    return %c0_i32, %c0_i32_0 : i32, i32
  }
  func.func @transform_5(%arg0: i32) -> (i32, i32) {
    %c0_i32 = arith.constant 0 : i32
    %c0_i32_0 = arith.constant 0 : i32
    %c0_i32_1 = arith.constant 0 : i32
    return %c0_i32, %c0_i32_0 : i32, i32
  }
}

</mosaic_0001>

<bundles_post_ra>
// kernel: inception_aux_forward.1
= control target key start
LH: loop header
LB: loop body
LE: loop exit
PB: predicated region body
PF: predicated region fallthrough
CT: control target
= control target key end

     0   :  { %10 = vsyncpa [#allocation4], 0  ;;  %s2332_s0 = inlined_call_operand.vmem [shape: f32[8,256], index: 0, kind: input, shape index: {}]   ;;  %s2333_s1 = inlined_call_operand.hbm [shape: bf16[256,1024], index: 1, kind: input, shape index: {}]   ;;  %s2334_s2 = inlined_call_operand.vmem [shape: f32[1,1024], index: 2, kind: input, shape index: {}]   ;;  %s2335_s3 = inlined_call_operand.hbm [shape: bf16[1024,128], index: 3, kind: input, shape index: {}]   ;;  %s2336_s4 = inlined_call_operand.vmem [shape: f32[1,128], index: 4, kind: input, shape index: {}]   ;;  %s2337_s5 = inlined_call_operand.vmem [shape: f32[8,128], index: 5, kind: output, shape index: {}]  }
   0x1   :  { %11 = vsyncpa [#allocation6], 0  ;;  %s2235_s18 = smov [#allocation3]  }
   0x2   :  { %s19_s19 = sshll.u32 %s2235_s18, 4  ;;  %s20_s19 = int_to_ptr.vmem [resolvable:$true] %s19_s19 }
   0x3   :  { %s2199_s20 = scalar_lea.vmem %s20_s19, 16384  ;;  %p2204_p1 = scmp.lt.s32.totalorder %s20_s19, %s20_s19 }
   0x4   :  { %p2200_p0 = scmp.ne.s32.totalorder %s20_s19, %s2199_s20  ;;  %p2205_p2 = scmp.lt.s32.totalorder %s2199_s20, %s2199_s20 }
   0x6   :  { %p2206_p3 = por %p2205_p2, %p2204_p1 }
   0x8   :  { %p2207_p4 = pnand %p2206_p3, %p2200_p0 }
   0xa   :  { %2210 = shalt.err (!%p2207_p4)
}
   0xb   :  { %s2236_s21 = smov 512   ;;  %s2237_s22 = smov 32  }
   0xc   :  { %25 = dma.hbm_to_vmem [thread:$0]  %s2333_s1, 16384, %s20_s19, [#allocation4], %s2236_s21, %s2236_s21, %s2237_s22  }
   0xd   :  { %s2238_s25 = smov [#allocation5]  }
   0xe   :  { %s33_s26 = sshll.u32 %s2238_s25, 4  ;;  %s34_s26 = int_to_ptr.vmem [resolvable:$true] %s33_s26 }
   0xf   :  { %s2219_s27 = scalar_lea.vmem %s34_s26, 8192  ;;  %p2224_p6 = scmp.lt.s32.totalorder %s34_s26, %s34_s26 }
  0x10   :  { %p2220_p5 = scmp.ne.s32.totalorder %s34_s26, %s2219_s27  ;;  %p2225_p7 = scmp.lt.s32.totalorder %s2219_s27, %s2219_s27 }
  0x12   :  { %p2226_p8 = por %p2225_p7, %p2224_p6 }
  0x14   :  { %p2227_p9 = pnand %p2226_p8, %p2220_p5 }
  0x16   :  { %2230 = shalt.err (!%p2227_p9)
}
  0x17   :  { %s2239_s28 = smov 64   ;;  %s2240_s29 = smov 4  }
  0x18   :  { %39 = dma.hbm_to_vmem [thread:$0]  %s2335_s3, 8192, %s34_s26, [#allocation6], %s2239_s28, %s2239_s28, %s2240_s29  }
  0x19   :  { %2231 = dma.done.wait [#allocation4], 16384  }
  0x1a   :  { %2232 = vsyncadd [#allocation4], 4294950912 }
  0x1b   :  { %2233 = dma.done.wait [#allocation6], 8192  }
  0x1c   :  { %2234 = vsyncadd [#allocation6], 4294959104  ;;  %v113_v0 = vld [vmem:[#allocation3 + $0x1c0] sm:$0xff]  ;;  %v114_v2 = vld [vmem:[#allocation3 + $0x1c8] sm:$0xff] }
  0x1d   :  { %v117_v1 = vld [vmem:[#allocation3 + $0x1e0] sm:$0xff]  ;;  %v118_v4 = vld [vmem:[#allocation3 + $0x1e8] sm:$0xff] }
  0x1e   :  { %v1654_v3 = vcombine.high %v113_v0, %v117_v1  ;;  %v1653_v5 = vcombine.low %v113_v0, %v117_v1  ;;  %v105_v6 = vld [vmem:[#allocation3 + $0x180] sm:$0xff]  ;;  %v1656_v8 = vcombine.high %v114_v2, %v118_v4  ;;  %v1655_v9 = vcombine.low %v114_v2, %v118_v4  ;;  %v106_v11 = vld [vmem:[#allocation3 + $0x188] sm:$0xff] }
  0x1f   :  { %v109_v7 = vld [vmem:[#allocation3 + $0x1a0] sm:$0xff]  ;;  %v110_v12 = vld [vmem:[#allocation3 + $0x1a8] sm:$0xff] }
  0x20   :  { %v1646_v10 = vcombine.high %v105_v6, %v109_v7  ;;  %v97_v13 = vld [vmem:[#allocation3 + $0x140] sm:$0xff]  ;;  %867 = vmatprep.subr.bf16.mxu0 %v1654_v3  ;;  %v1648_v14 = vcombine.high %v106_v11, %v110_v12  ;;  %v98_v16 = vld [vmem:[#allocation3 + $0x148] sm:$0xff]  ;;  %908 = vmatprep.subr.bf16.mxu1 %v1656_v8  ;;  %v1645_v18 = vcombine.low %v105_v6, %v109_v7 }
  0x21   :  { %v101_v15 = vld [vmem:[#allocation3 + $0x160] sm:$0xff]  ;;  %v102_v17 = vld [vmem:[#allocation3 + $0x168] sm:$0xff]  ;;  %868 = vmatpush1.bf16.msra.mxu0 %v1653_v5  ;;  %909 = vmatpush1.bf16.msra.mxu1 %v1655_v9  ;;  %v1647_v19 = vcombine.low %v106_v11, %v110_v12 }
  0x22   :  { %869 = vmatprep.subr.bf16.mxu0 %v1646_v10  ;;  %v1638_v20 = vcombine.high %v97_v13, %v101_v15  ;;  %910 = vmatprep.subr.bf16.mxu1 %v1648_v14  ;;  %v1640_v21 = vcombine.high %v98_v16, %v102_v17  ;;  %v89_v22 = vld [vmem:[#allocation3 + $0x100] sm:$0xff]  ;;  %v90_v24 = vld [vmem:[#allocation3 + $0x108] sm:$0xff]  ;;  %v1637_v26 = vcombine.low %v97_v13, %v101_v15 }
  0x23   :  { %v93_v23 = vld [vmem:[#allocation3 + $0x120] sm:$0xff]  ;;  %v94_v25 = vld [vmem:[#allocation3 + $0x128] sm:$0xff]  ;;  %v1639_v27 = vcombine.low %v98_v16, %v102_v17 }
  0x24   :  { %v1630_v28 = vcombine.high %v89_v22, %v93_v23  ;;  %v1632_v29 = vcombine.high %v90_v24, %v94_v25  ;;  %v81_v30 = vld [vmem:[#allocation3 + $0xc0] sm:$0xff]  ;;  %v82_v32 = vld [vmem:[#allocation3 + $0xc8] sm:$0xff]  ;;  %v1629_v34 = vcombine.low %v89_v22, %v93_v23  ;;  %v1631_v35 = vcombine.low %v90_v24, %v94_v25 }
  0x25   :  { %870 = vmatpush1.bf16.msra.mxu0 %v1645_v18  ;;  %911 = vmatpush1.bf16.msra.mxu1 %v1647_v19  ;;  %v85_v31 = vld [vmem:[#allocation3 + $0xe0] sm:$0xff]  ;;  %v86_v33 = vld [vmem:[#allocation3 + $0xe8] sm:$0xff] }
  0x26   :  { %871 = vmatprep.subr.bf16.mxu0 %v1638_v20  ;;  %912 = vmatprep.subr.bf16.mxu1 %v1640_v21  ;;  %v1622_v36 = vcombine.high %v81_v30, %v85_v31  ;;  %v1624_v37 = vcombine.high %v82_v32, %v86_v33  ;;  %v73_v38 = vld [vmem:[#allocation3 + $0x80] sm:$0xff]  ;;  %v74_v40 = vld [vmem:[#allocation3 + $0x88] sm:$0xff]  ;;  %v1621_v42 = vcombine.low %v81_v30, %v85_v31 }
  0x27   :  { %v77_v39 = vld [vmem:[#allocation3 + $0xa0] sm:$0xff]  ;;  %v78_v41 = vld [vmem:[#allocation3 + $0xa8] sm:$0xff]  ;;  %v1623_v43 = vcombine.low %v82_v32, %v86_v33 }
  0x28   :  { %v1614_v44 = vcombine.high %v73_v38, %v77_v39  ;;  %v1616_v45 = vcombine.high %v74_v40, %v78_v41  ;;  %v65_v46 = vld [vmem:[#allocation3 + $0x40] sm:$0xff]  ;;  %v66_v48 = vld [vmem:[#allocation3 + $0x48] sm:$0xff]  ;;  %v1613_v50 = vcombine.low %v73_v38, %v77_v39  ;;  %v1615_v51 = vcombine.low %v74_v40, %v78_v41 }
  0x29   :  { %872 = vmatpush1.bf16.msra.mxu0 %v1637_v26  ;;  %913 = vmatpush1.bf16.msra.mxu1 %v1639_v27  ;;  %v69_v47 = vld [vmem:[#allocation3 + $0x60] sm:$0xff]  ;;  %v70_v49 = vld [vmem:[#allocation3 + $0x68] sm:$0xff] }
  0x2a   :  { %873 = vmatprep.subr.bf16.mxu0 %v1630_v28  ;;  %914 = vmatprep.subr.bf16.mxu1 %v1632_v29  ;;  %v1606_v52 = vcombine.high %v65_v46, %v69_v47  ;;  %v54_v53 = vld [vmem:[%s2332_s0 + $0x8] sm:$0xff]  ;;  %v1608_v54 = vcombine.high %v66_v48, %v70_v49  ;;  %v57_v55 = vld [vmem:[#allocation3] sm:$0xff]  ;;  %v1605_v60 = vcombine.low %v65_v46, %v69_v47 }
  0x2b   :  { %v61_v56 = vld [vmem:[#allocation3 + $0x20] sm:$0xff]  ;;  %v2280_v57 = vpack.c.bf16 %v54_v53, %v54_v53  ;;  %v58_v58 = vld [vmem:[#allocation3 + $0x8] sm:$0xff]  ;;  %v1607_v61 = vcombine.low %v66_v48, %v70_v49 }
  0x2c   :  { %v62_v59 = vld [vmem:[#allocation3 + $0x28] sm:$0xff]  ;;  %v1598_v62 = vcombine.high %v57_v55, %v61_v56  ;;  %v177_v0 = vld [vmem:[#allocation3 + $0x3c0] sm:$0xff]  ;;  %v1597_v4 = vcombine.low %v57_v55, %v61_v56 }
  0x2d   :  { %874 = vmatpush1.bf16.msra.mxu0 %v1629_v34  ;;  %915 = vmatpush1.bf16.msra.mxu1 %v1631_v35  ;;  %v1600_v63 = vcombine.high %v58_v58, %v62_v59  ;;  %v181_v1 = vld [vmem:[#allocation3 + $0x3e0] sm:$0xff]  ;;  %v178_v2 = vld [vmem:[#allocation3 + $0x3c8] sm:$0xff]  ;;  %v1599_v5 = vcombine.low %v58_v58, %v62_v59 }
  0x2e   :  { %875 = vmatprep.subr.bf16.mxu0 %v1622_v36  ;;  %916 = vmatprep.subr.bf16.mxu1 %v1624_v37  ;;  %v182_v3 = vld [vmem:[#allocation3 + $0x3e8] sm:$0xff]  ;;  %v1718_v6 = vcombine.high %v177_v0, %v181_v1  ;;  %v169_v8 = vld [vmem:[#allocation3 + $0x380] sm:$0xff]  ;;  %v1717_v12 = vcombine.low %v177_v0, %v181_v1  ;;  %v115_v1 = vld [vmem:[#allocation3 + $0x1d0] sm:$0xff] }
  0x2f   :  { %899 = vmatprep.mubr.bf16.mxu0 %v2280_v57  ;;  %940 = vmatprep.mubr.bf16.mxu1 %v2280_v57  ;;  %v1720_v7 = vcombine.high %v178_v2, %v182_v3  ;;  %v173_v9 = vld [vmem:[#allocation3 + $0x3a0] sm:$0xff]  ;;  %v170_v10 = vld [vmem:[#allocation3 + $0x388] sm:$0xff]  ;;  %v1719_v13 = vcombine.low %v178_v2, %v182_v3  ;;  %v119_v2 = vld [vmem:[#allocation3 + $0x1f0] sm:$0xff] }
  0x30   :  { %v174_v11 = vld [vmem:[#allocation3 + $0x3a8] sm:$0xff]  ;;  %v1710_v14 = vcombine.high %v169_v8, %v173_v9  ;;  %v161_v16 = vld [vmem:[#allocation3 + $0x340] sm:$0xff]  ;;  %v1709_v20 = vcombine.low %v169_v8, %v173_v9  ;;  %v116_v3 = vld [vmem:[#allocation3 + $0x1d8] sm:$0xff]  ;;  %v1658_v8 = vcombine.high %v115_v1, %v119_v2 }
  0x31   :  { %876 = vmatpush1.bf16.msra.mxu0 %v1621_v42  ;;  %917 = vmatpush1.bf16.msra.mxu1 %v1623_v43  ;;  %v1712_v15 = vcombine.high %v170_v10, %v174_v11  ;;  %v165_v17 = vld [vmem:[#allocation3 + $0x360] sm:$0xff]  ;;  %v162_v18 = vld [vmem:[#allocation3 + $0x348] sm:$0xff]  ;;  %v1711_v21 = vcombine.low %v170_v10, %v174_v11  ;;  %v107_v10 = vld [vmem:[#allocation3 + $0x190] sm:$0xff] }
  0x32   :  { %877 = vmatprep.subr.bf16.mxu0 %v1614_v44  ;;  %918 = vmatprep.subr.bf16.mxu1 %v1616_v45  ;;  %v166_v19 = vld [vmem:[#allocation3 + $0x368] sm:$0xff]  ;;  %v1702_v22 = vcombine.high %v161_v16, %v165_v17  ;;  %v153_v24 = vld [vmem:[#allocation3 + $0x300] sm:$0xff]  ;;  %v1701_v28 = vcombine.low %v161_v16, %v165_v17  ;;  %v111_v11 = vld [vmem:[#allocation3 + $0x1b0] sm:$0xff] }
  0x33   :  { %v1704_v23 = vcombine.high %v162_v18, %v166_v19  ;;  %v157_v25 = vld [vmem:[#allocation3 + $0x320] sm:$0xff]  ;;  %v154_v26 = vld [vmem:[#allocation3 + $0x308] sm:$0xff]  ;;  %v1703_v29 = vcombine.low %v162_v18, %v166_v19  ;;  %v1650_v17 = vcombine.high %v107_v10, %v111_v11  ;;  %v99_v19 = vld [vmem:[#allocation3 + $0x150] sm:$0xff] }
  0x34   :  { %v158_v27 = vld [vmem:[#allocation3 + $0x328] sm:$0xff]  ;;  %v1694_v30 = vcombine.high %v153_v24, %v157_v25  ;;  %v145_v32 = vld [vmem:[#allocation3 + $0x2c0] sm:$0xff]  ;;  %v1693_v36 = vcombine.low %v153_v24, %v157_v25 }
  0x35   :  { %878 = vmatpush1.bf16.msra.mxu0 %v1613_v50  ;;  %919 = vmatpush1.bf16.msra.mxu1 %v1615_v51  ;;  %v1696_v31 = vcombine.high %v154_v26, %v158_v27  ;;  %v149_v33 = vld [vmem:[#allocation3 + $0x2e0] sm:$0xff]  ;;  %v146_v34 = vld [vmem:[#allocation3 + $0x2c8] sm:$0xff]  ;;  %v1695_v37 = vcombine.low %v154_v26, %v158_v27  ;;  %v91_v27 = vld [vmem:[#allocation3 + $0x110] sm:$0xff] }
  0x36   :  { %879 = vmatprep.subr.bf16.mxu0 %v1606_v52  ;;  %920 = vmatprep.subr.bf16.mxu1 %v1608_v54  ;;  %v150_v35 = vld [vmem:[#allocation3 + $0x2e8] sm:$0xff]  ;;  %v1686_v38 = vcombine.high %v145_v32, %v149_v33  ;;  %v137_v40 = vld [vmem:[#allocation3 + $0x280] sm:$0xff]  ;;  %v1685_v44 = vcombine.low %v145_v32, %v149_v33 }
  0x37   :  { %v1688_v39 = vcombine.high %v146_v34, %v150_v35  ;;  %v141_v41 = vld [vmem:[#allocation3 + $0x2a0] sm:$0xff]  ;;  %v138_v42 = vld [vmem:[#allocation3 + $0x288] sm:$0xff]  ;;  %v1687_v45 = vcombine.low %v146_v34, %v150_v35  ;;  %v83_v35 = vld [vmem:[#allocation3 + $0xd0] sm:$0xff] }
  0x38   :  { %v142_v43 = vld [vmem:[#allocation3 + $0x2a8] sm:$0xff]  ;;  %v1678_v46 = vcombine.high %v137_v40, %v141_v41  ;;  %v129_v48 = vld [vmem:[#allocation3 + $0x240] sm:$0xff]  ;;  %v1677_v52 = vcombine.low %v137_v40, %v141_v41 }
  0x39   :  { %880 = vmatpush1.bf16.msra.mxu0 %v1605_v60  ;;  %921 = vmatpush1.bf16.msra.mxu1 %v1607_v61  ;;  %v1680_v47 = vcombine.high %v138_v42, %v142_v43  ;;  %v133_v49 = vld [vmem:[#allocation3 + $0x260] sm:$0xff]  ;;  %v130_v50 = vld [vmem:[#allocation3 + $0x248] sm:$0xff]  ;;  %v1679_v53 = vcombine.low %v138_v42, %v142_v43  ;;  %v75_v42 = vld [vmem:[#allocation3 + $0x90] sm:$0xff] }
  0x3a   :  { %881 = vmatprep.subr.bf16.mxu0 %v1598_v62  ;;  %922 = vmatprep.subr.bf16.mxu1 %v1600_v63  ;;  %v134_v51 = vld [vmem:[#allocation3 + $0x268] sm:$0xff]  ;;  %v1670_v54 = vcombine.high %v129_v48, %v133_v49  ;;  %v121_v56 = vld [vmem:[#allocation3 + $0x200] sm:$0xff]  ;;  %v1669_v61 = vcombine.low %v129_v48, %v133_v49  ;;  %v79_v43 = vld [vmem:[#allocation3 + $0xb0] sm:$0xff] }
  0x3b   :  { %v1672_v55 = vcombine.high %v130_v50, %v134_v51  ;;  %v125_v58 = vld [vmem:[#allocation3 + $0x220] sm:$0xff]  ;;  %v122_v59 = vld [vmem:[#allocation3 + $0x208] sm:$0xff]  ;;  %v1671_v62 = vcombine.low %v130_v50, %v134_v51  ;;  %v1618_v48 = vcombine.high %v75_v42, %v79_v43  ;;  %v67_v50 = vld [vmem:[#allocation3 + $0x50] sm:$0xff] }
  0x3c   :  { %v126_v60 = vld [vmem:[#allocation3 + $0x228] sm:$0xff]  ;;  %v1662_v63 = vcombine.high %v121_v56, %v125_v58  ;;  %v71_v51 = vld [vmem:[#allocation3 + $0x70] sm:$0xff] }
  0x3d   :  { %882 = vmatpush1.bf16.msra.mxu0 %v1597_v4  ;;  %923 = vmatpush1.bf16.msra.mxu1 %v1599_v5  ;;  %v1664_v0 = vcombine.high %v122_v59, %v126_v60  ;;  %v120_v4 = vld [vmem:[#allocation3 + $0x1f8] sm:$0xff]  ;;  %v1661_v5 = vcombine.low %v121_v56, %v125_v58  ;;  %v1610_v56 = vcombine.high %v67_v50, %v71_v51 }
  0x3e   :  { %883 = vmatprep.subr.bf16.mxu0 %v1718_v6  ;;  %924 = vmatprep.subr.bf16.mxu1 %v1720_v7  ;;  %v53_v6 = vld [vmem:[%s2332_s0] sm:$0xff]  ;;  %v1663_v7 = vcombine.low %v122_v59, %v126_v60  ;;  %v1660_v9 = vcombine.high %v116_v3, %v120_v4  ;;  %v1659_v16 = vcombine.low %v116_v3, %v120_v4  ;;  %v59_v59 = vld [vmem:[#allocation3 + $0x10] sm:$0xff] }
  0x3f   :  { %v63_v60 = vld [vmem:[#allocation3 + $0x30] sm:$0xff] }
  0x40   :  { %v179_v3 = vld [vmem:[#allocation3 + $0x3d0] sm:$0xff] }
  0x41   :  { %884 = vmatpush2.bf16.msra.mxu0 %v1717_v12  ;;  %925 = vmatpush2.bf16.msra.mxu1 %v1719_v13  ;;  %v2287_v12 = vpack.c.bf16 %v53_v6, %v53_v6  ;;  %v108_v13 = vld [vmem:[#allocation3 + $0x198] sm:$0xff]  ;;  %v183_v4 = vld [vmem:[#allocation3 + $0x3f0] sm:$0xff] }
  0x42   :  { %885 = vmatprep.subr.bf16.mxu0 %v1710_v14  ;;  %926 = vmatprep.subr.bf16.mxu1 %v1712_v15  ;;  %v112_v14 = vld [vmem:[#allocation3 + $0x1b8] sm:$0xff]  ;;  %v1657_v15 = vcombine.low %v115_v1, %v119_v2  ;;  %v1602_v1 = vcombine.high %v59_v59, %v63_v60 }
  0x43   :  { %v1652_v18 = vcombine.high %v108_v13, %v112_v14  ;;  %v1651_v24 = vcombine.low %v108_v13, %v112_v14  ;;  %v184_v6 = vld [vmem:[#allocation3 + $0x3f8] sm:$0xff]  ;;  %v175_v13 = vld [vmem:[#allocation3 + $0x3b0] sm:$0xff] }
  0x44   :  { %v172_v14 = vld [vmem:[#allocation3 + $0x398] sm:$0xff] }
  0x45   :  { %886 = vmatpush2.bf16.msra.mxu0 %v1709_v20  ;;  %927 = vmatpush2.bf16.msra.mxu1 %v1711_v21  ;;  %v103_v20 = vld [vmem:[#allocation3 + $0x170] sm:$0xff]  ;;  %v100_v21 = vld [vmem:[#allocation3 + $0x158] sm:$0xff] }
  0x46   :  { %887 = vmatprep.subr.bf16.mxu0 %v1702_v22  ;;  %928 = vmatprep.subr.bf16.mxu1 %v1704_v23  ;;  %v104_v22 = vld [vmem:[#allocation3 + $0x178] sm:$0xff]  ;;  %v1649_v23 = vcombine.low %v107_v10, %v111_v11  ;;  %v1642_v25 = vcombine.high %v99_v19, %v103_v20  ;;  %v171_v11 = vld [vmem:[#allocation3 + $0x390] sm:$0xff] }
  0x47   :  { %v1644_v26 = vcombine.high %v100_v21, %v104_v22  ;;  %v1643_v32 = vcombine.low %v100_v21, %v104_v22  ;;  %v167_v21 = vld [vmem:[#allocation3 + $0x370] sm:$0xff]  ;;  %v164_v22 = vld [vmem:[#allocation3 + $0x358] sm:$0xff] }
  0x49   :  { %888 = vmatpush2.bf16.msra.mxu0 %v1701_v28  ;;  %929 = vmatpush2.bf16.msra.mxu1 %v1703_v29  ;;  %v95_v28 = vld [vmem:[#allocation3 + $0x130] sm:$0xff]  ;;  %v92_v29 = vld [vmem:[#allocation3 + $0x118] sm:$0xff] }
  0x4a   :  { %889 = vmatprep.subr.bf16.mxu0 %v1694_v30  ;;  %930 = vmatprep.subr.bf16.mxu1 %v1696_v31  ;;  %v96_v30 = vld [vmem:[#allocation3 + $0x138] sm:$0xff]  ;;  %v1641_v31 = vcombine.low %v99_v19, %v103_v20  ;;  %v1634_v33 = vcombine.high %v91_v27, %v95_v28  ;;  %v163_v20 = vld [vmem:[#allocation3 + $0x350] sm:$0xff] }
  0x4b   :  { %v1636_v34 = vcombine.high %v92_v29, %v96_v30  ;;  %v1635_v40 = vcombine.low %v92_v29, %v96_v30  ;;  %v159_v29 = vld [vmem:[#allocation3 + $0x330] sm:$0xff]  ;;  %v156_v30 = vld [vmem:[#allocation3 + $0x318] sm:$0xff] }
  0x4d   :  { %890 = vmatpush2.bf16.msra.mxu0 %v1693_v36  ;;  %931 = vmatpush2.bf16.msra.mxu1 %v1695_v37  ;;  %v87_v36 = vld [vmem:[#allocation3 + $0xf0] sm:$0xff]  ;;  %v84_v37 = vld [vmem:[#allocation3 + $0xd8] sm:$0xff] }
  0x4e   :  { %891 = vmatprep.subr.bf16.mxu0 %v1686_v38  ;;  %932 = vmatprep.subr.bf16.mxu1 %v1688_v39  ;;  %v88_v38 = vld [vmem:[#allocation3 + $0xf8] sm:$0xff]  ;;  %v1633_v39 = vcombine.low %v91_v27, %v95_v28  ;;  %v1626_v41 = vcombine.high %v83_v35, %v87_v36  ;;  %v155_v28 = vld [vmem:[#allocation3 + $0x310] sm:$0xff] }
  0x51   :  { %892 = vmatpush2.bf16.msra.mxu0 %v1685_v44  ;;  %933 = vmatpush2.bf16.msra.mxu1 %v1687_v45  ;;  %v76_v44 = vld [vmem:[#allocation3 + $0x98] sm:$0xff] }
  0x52   :  { %893 = vmatprep.subr.bf16.mxu0 %v1678_v46  ;;  %934 = vmatprep.subr.bf16.mxu1 %v1680_v47  ;;  %v80_v45 = vld [vmem:[#allocation3 + $0xb8] sm:$0xff]  ;;  %v1625_v46 = vcombine.low %v83_v35, %v87_v36  ;;  %v1627_v47 = vcombine.low %v84_v37, %v88_v38  ;;  %v147_v36 = vld [vmem:[#allocation3 + $0x2d0] sm:$0xff] }
  0x53   :  { %v1620_v49 = vcombine.high %v76_v44, %v80_v45 }
  0x55   :  { %894 = vmatpush2.bf16.msra.mxu0 %v1677_v52  ;;  %935 = vmatpush2.bf16.msra.mxu1 %v1679_v53  ;;  %v68_v52 = vld [vmem:[#allocation3 + $0x58] sm:$0xff] }
  0x56   :  { %895 = vmatprep.subr.bf16.mxu0 %v1670_v54  ;;  %936 = vmatprep.subr.bf16.mxu1 %v1672_v55  ;;  %v72_v53 = vld [vmem:[#allocation3 + $0x78] sm:$0xff]  ;;  %v1617_v54 = vcombine.low %v75_v42, %v79_v43  ;;  %v1619_v55 = vcombine.low %v76_v44, %v80_v45  ;;  %v139_v43 = vld [vmem:[#allocation3 + $0x290] sm:$0xff] }
  0x57   :  { %v1612_v58 = vcombine.high %v68_v52, %v72_v53  ;;  %v143_v44 = vld [vmem:[#allocation3 + $0x2b0] sm:$0xff]  ;;  %v140_v45 = vld [vmem:[#allocation3 + $0x298] sm:$0xff] }
  0x59   :  { %896 = vmatpush2.bf16.msra.mxu0 %v1669_v61  ;;  %937 = vmatpush2.bf16.msra.mxu1 %v1671_v62  ;;  %v60_v61 = vld [vmem:[#allocation3 + $0x18] sm:$0xff] }
  0x5a   :  { %897 = vmatprep.subr.bf16.mxu0 %v1662_v63  ;;  %938 = vmatprep.subr.bf16.mxu1 %v1664_v0  ;;  %v64_v62 = vld [vmem:[#allocation3 + $0x38] sm:$0xff]  ;;  %v1609_v63 = vcombine.low %v67_v50, %v71_v51  ;;  %v1611_v0 = vcombine.low %v68_v52, %v72_v53  ;;  %v131_v51 = vld [vmem:[#allocation3 + $0x250] sm:$0xff] }
  0x5b   :  { %v1604_v2 = vcombine.high %v60_v61, %v64_v62  ;;  %v135_v52 = vld [vmem:[#allocation3 + $0x270] sm:$0xff]  ;;  %v132_v53 = vld [vmem:[#allocation3 + $0x258] sm:$0xff] }
  0x5d   :  { %898 = vmatpush2.bf16.msra.mxu0 %v1661_v5  ;;  %939 = vmatpush2.bf16.msra.mxu1 %v1663_v7  ;;  %v180_v5 = vld [vmem:[#allocation3 + $0x3d8] sm:$0xff]  ;;  %v1601_v7 = vcombine.low %v59_v59, %v63_v60  ;;  %v123_v60 = vld [vmem:[#allocation3 + $0x210] sm:$0xff] }
  0x5e   :  { %949 = vmatprep.subr.bf16.mxu0 %v1658_v8  ;;  %990 = vmatprep.subr.bf16.mxu1 %v1660_v9  ;;  %v1603_v8 = vcombine.low %v60_v61, %v64_v62  ;;  %v1722_v9 = vcombine.high %v179_v3, %v183_v4  ;;  %v1724_v10 = vcombine.high %v180_v5, %v184_v6  ;;  %v127_v61 = vld [vmem:[#allocation3 + $0x230] sm:$0xff]  ;;  %v124_v62 = vld [vmem:[#allocation3 + $0x218] sm:$0xff] }
  0x60   :  { %900 = vmatmul.mubr.bf16.vlgmr.msra.gmra.mxu0 %v2287_v12  ;;  %941 = vmatmul.mubr.bf16.vlgmr.msra.gmra.mxu1 %v2287_v12 }
  0x61   :  { %950 = vmatpush1.bf16.msra.mxu0 %v1657_v15  ;;  %991 = vmatpush1.bf16.msra.mxu1 %v1659_v16  ;;  %v176_v15 = vld [vmem:[#allocation3 + $0x3b8] sm:$0xff]  ;;  %v1721_v16 = vcombine.low %v179_v3, %v183_v4 }
  0x62   :  { %951 = vmatprep.subr.bf16.mxu0 %v1650_v17  ;;  %992 = vmatprep.subr.bf16.mxu1 %v1652_v18  ;;  %v1723_v17 = vcombine.low %v180_v5, %v184_v6  ;;  %v1714_v18 = vcombine.high %v171_v11, %v175_v13  ;;  %v1716_v19 = vcombine.high %v172_v14, %v176_v15  ;;  %v1996_v4 = vld [vmem:[#allocation5 + $0x78] sm:$0xff]  }
  0x63   :  { %981 = vmatprep.mubr.bf16.mxu0 %v2280_v57  ;;  %1022 = vmatprep.mubr.bf16.mxu1 %v2280_v57  ;;  %v1628_v57 = vcombine.high %v84_v37, %v88_v38  ;;  %v151_v37 = vld [vmem:[#allocation3 + $0x2f0] sm:$0xff]  ;;  %v148_v38 = vld [vmem:[#allocation3 + $0x2d8] sm:$0xff]  ;;  %v1665_v6 = vcombine.low %v123_v60, %v127_v61 }
  0x64   :  { %v2012_v5 = vld [vmem:[#allocation5 + $0xf8] sm:$0xff]  }
  0x65   :  { %952 = vmatpush1.bf16.msra.mxu0 %v1649_v23  ;;  %993 = vmatpush1.bf16.msra.mxu1 %v1651_v24  ;;  %v168_v23 = vld [vmem:[#allocation3 + $0x378] sm:$0xff]  ;;  %v1713_v24 = vcombine.low %v171_v11, %v175_v13 }
  0x66   :  { %953 = vmatprep.subr.bf16.mxu0 %v1642_v25  ;;  %994 = vmatprep.subr.bf16.mxu1 %v1644_v26  ;;  %v1715_v25 = vcombine.low %v172_v14, %v176_v15  ;;  %v1706_v26 = vcombine.high %v163_v20, %v167_v21  ;;  %v1708_v27 = vcombine.high %v164_v22, %v168_v23  ;;  %v2004_v11 = vld [vmem:[#allocation5 + $0xb8] sm:$0xff]   ;;  %v1995_v14 = vld [vmem:[#allocation5 + $0x70] sm:$0xff]  }
  0x67   :  { %v1821_v15 = vunpack.c.h.bf16 %v2004_v11 }
  0x69   :  { %954 = vmatpush1.bf16.msra.mxu0 %v1641_v31  ;;  %995 = vmatpush1.bf16.msra.mxu1 %v1643_v32  ;;  %v160_v31 = vld [vmem:[#allocation3 + $0x338] sm:$0xff]  ;;  %v1705_v32 = vcombine.low %v163_v20, %v167_v21  ;;  %v2003_v21 = vld [vmem:[#allocation5 + $0xb0] sm:$0xff]  }
  0x6a   :  { %955 = vmatprep.subr.bf16.mxu0 %v1634_v33  ;;  %996 = vmatprep.subr.bf16.mxu1 %v1636_v34  ;;  %v1707_v33 = vcombine.low %v164_v22, %v168_v23  ;;  %v1698_v34 = vcombine.high %v155_v28, %v159_v29  ;;  %v1700_v35 = vcombine.high %v156_v30, %v160_v31  ;;  %v1820_v22 = vunpack.c.l.bf16 %v2004_v11 }
  0x6b   :  { %v1785_v23 = vunpack.c.h.bf16 %v1995_v14 }
  0x6d   :  { %956 = vmatpush1.bf16.msra.mxu0 %v1633_v39  ;;  %997 = vmatpush1.bf16.msra.mxu1 %v1635_v40  ;;  %v152_v39 = vld [vmem:[#allocation3 + $0x2f8] sm:$0xff]  ;;  %v1697_v40 = vcombine.low %v155_v28, %v159_v29  ;;  %v1784_v28 = vunpack.c.l.bf16 %v1995_v14  ;;  %v2010_v29 = vld [vmem:[#allocation5 + $0xe8] sm:$0xff]  }
  0x6e   :  { %957 = vmatprep.subr.bf16.mxu0 %v1626_v41  ;;  %998 = vmatprep.subr.bf16.mxu1 %v1628_v57  ;;  %v1699_v41 = vcombine.low %v156_v30, %v160_v31  ;;  %v1690_v57 = vcombine.high %v147_v36, %v151_v37  ;;  %v1692_v42 = vcombine.high %v148_v38, %v152_v39  ;;  %v1986_v30 = vld [vmem:[#allocation5 + $0x28] sm:$0xff]  }
  0x6f   :  { %v1982_v14 = vld [vmem:[#allocation5 + $0x8] sm:$0xff]  }
  0x71   :  { %958 = vmatpush1.bf16.msra.mxu0 %v1625_v46  ;;  %999 = vmatpush1.bf16.msra.mxu1 %v1627_v47  ;;  %v144_v46 = vld [vmem:[#allocation3 + $0x2b8] sm:$0xff]  ;;  %v1689_v47 = vcombine.low %v147_v36, %v151_v37  ;;  %v1749_v36 = vunpack.c.h.bf16 %v1986_v30  ;;  %v1993_v37 = vld [vmem:[#allocation5 + $0x60] sm:$0xff]  }
  0x72   :  { %959 = vmatprep.subr.bf16.mxu0 %v1618_v48  ;;  %1000 = vmatprep.subr.bf16.mxu1 %v1620_v49  ;;  %v1691_v48 = vcombine.low %v148_v38, %v152_v39  ;;  %v1682_v49 = vcombine.high %v139_v43, %v143_v44  ;;  %v1684_v50 = vcombine.high %v140_v45, %v144_v46 }
  0x75   :  { %960 = vmatpush1.bf16.msra.mxu0 %v1617_v54  ;;  %1001 = vmatpush1.bf16.msra.mxu1 %v1619_v55  ;;  %v136_v54 = vld [vmem:[#allocation3 + $0x278] sm:$0xff]  ;;  %v1681_v55 = vcombine.low %v139_v43, %v143_v44  ;;  %v2001_v43 = vld [vmem:[#allocation5 + $0xa0] sm:$0xff]  }
  0x76   :  { %961 = vmatprep.subr.bf16.mxu0 %v1610_v56  ;;  %1002 = vmatprep.subr.bf16.mxu1 %v1612_v58  ;;  %v1683_v56 = vcombine.low %v140_v45, %v144_v46  ;;  %v1674_v58 = vcombine.high %v131_v51, %v135_v52  ;;  %v1676_v59 = vcombine.high %v132_v53, %v136_v54  ;;  %v1777_v45 = vunpack.c.h.bf16 %v1993_v37 }
  0x79   :  { %962 = vmatpush1.bf16.msra.mxu0 %v1609_v63  ;;  %1003 = vmatpush1.bf16.msra.mxu1 %v1611_v0  ;;  %v128_v63 = vld [vmem:[#allocation3 + $0x238] sm:$0xff]  ;;  %v1673_v0 = vcombine.low %v131_v51, %v135_v52 }
  0x7a   :  { %963 = vmatprep.subr.bf16.mxu0 %v1602_v1  ;;  %1004 = vmatprep.subr.bf16.mxu1 %v1604_v2  ;;  %v1675_v1 = vcombine.low %v132_v53, %v136_v54  ;;  %v1666_v2 = vcombine.high %v123_v60, %v127_v61  ;;  %v1668_v3 = vcombine.high %v124_v62, %v128_v63  ;;  %v2008_v51 = vld [vmem:[#allocation5 + $0xd8] sm:$0xff]   ;;  %v1991_v61 = vld [vmem:[#allocation5 + $0x50] sm:$0xff]  }
  0x7b   :  { %v1984_v52 = vld [vmem:[#allocation5 + $0x18] sm:$0xff]   ;;  %v1768_v11 = vunpack.c.l.bf16 %v1991_v61 }
  0x7c   :  { %v1741_v60 = vunpack.c.h.bf16 %v1984_v52 }
  0x7d   :  { %964 = vmatpush1.bf16.msra.mxu0 %v1601_v7  ;;  %1005 = vmatpush1.bf16.msra.mxu1 %v1603_v8  ;;  %v1667_v7 = vcombine.low %v124_v62, %v128_v63  ;;  %v1789_v8 = vunpack.c.h.bf16 %v1996_v4 }
  0x7e   :  { %965 = vmatprep.subr.bf16.mxu0 %v1722_v9  ;;  %1006 = vmatprep.subr.bf16.mxu1 %v1724_v10  ;;  %v1988_v9 = vld [vmem:[#allocation5 + $0x38] sm:$0xff]   ;;  %v1853_v10 = vunpack.c.h.bf16 %v2012_v5 }
  0x7f   :  { %v1757_v13 = vunpack.c.h.bf16 %v1988_v9  ;;  %v1756_v20 = vunpack.c.l.bf16 %v1988_v9  ;;  %v1990_v9 = vld [vmem:[#allocation5 + $0x48] sm:$0xff]  }
  0x81   :  { %966 = vmatpush2.bf16.msra.mxu0 %v1721_v16  ;;  %1007 = vmatpush2.bf16.msra.mxu1 %v1723_v17  ;;  %v1788_v16 = vunpack.c.l.bf16 %v1996_v4  ;;  %v2011_v17 = vld [vmem:[#allocation5 + $0xf0] sm:$0xff]  }
  0x82   :  { %967 = vmatprep.subr.bf16.mxu0 %v1714_v18  ;;  %1008 = vmatprep.subr.bf16.mxu1 %v1716_v19  ;;  %v1987_v18 = vld [vmem:[#allocation5 + $0x30] sm:$0xff]   ;;  %v1852_v19 = vunpack.c.l.bf16 %v2012_v5  ;;  %v1848_v31 = vunpack.c.l.bf16 %v2011_v17 }
  0x83   :  { %v1999_v4 = vld [vmem:[#allocation5 + $0x90] sm:$0xff]  }
  0x85   :  { %968 = vmatpush2.bf16.msra.mxu0 %v1713_v24  ;;  %1009 = vmatpush2.bf16.msra.mxu1 %v1715_v25  ;;  %v1849_v24 = vunpack.c.h.bf16 %v2011_v17  ;;  %v1753_v25 = vunpack.c.h.bf16 %v1987_v18  ;;  %v1998_v17 = vld [vmem:[#allocation5 + $0x88] sm:$0xff]  }
  0x86   :  { %969 = vmatprep.subr.bf16.mxu0 %v1706_v26  ;;  %1010 = vmatprep.subr.bf16.mxu1 %v1708_v27  ;;  %v1994_v26 = vld [vmem:[#allocation5 + $0x68] sm:$0xff]   ;;  %v1817_v27 = vunpack.c.h.bf16 %v2003_v21 }
  0x87   :  { %v1780_v39 = vunpack.c.l.bf16 %v1994_v26 }
  0x89   :  { %970 = vmatpush2.bf16.msra.mxu0 %v1705_v32  ;;  %1011 = vmatpush2.bf16.msra.mxu1 %v1707_v33  ;;  %v1752_v32 = vunpack.c.l.bf16 %v1987_v18  ;;  %v2002_v33 = vld [vmem:[#allocation5 + $0xa8] sm:$0xff]   ;;  %v1800_v18 = vunpack.c.l.bf16 %v1999_v4 }
  0x8a   :  { %971 = vmatprep.subr.bf16.mxu0 %v1698_v34  ;;  %1012 = vmatprep.subr.bf16.mxu1 %v1700_v35  ;;  %v1816_v34 = vunpack.c.l.bf16 %v2003_v21  ;;  %v1781_v35 = vunpack.c.h.bf16 %v1994_v26  ;;  %v1813_v38 = vunpack.c.h.bf16 %v2002_v33  ;;  %v1812_v44 = vunpack.c.l.bf16 %v2002_v33  ;;  %v1727_v26 = vld [vmem:[#allocation5] sm:$0xff]  }
  0x8b   :  { %v1733_v21 = vunpack.c.h.bf16 %v1982_v14  ;;  %v1729_v33 = vunpack.c.h.bf16 %v1727_v26 }
  0x8d   :  { %972 = vmatpush2.bf16.msra.mxu0 %v1697_v40  ;;  %1013 = vmatpush2.bf16.msra.mxu1 %v1699_v41  ;;  %v2009_v40 = vld [vmem:[#allocation5 + $0xe0] sm:$0xff]  }
  0x8e   :  { %973 = vmatprep.subr.bf16.mxu0 %v1690_v57  ;;  %1014 = vmatprep.subr.bf16.mxu1 %v1692_v42  ;;  %v1985_v41 = vld [vmem:[#allocation5 + $0x20] sm:$0xff]   ;;  %v1844_v57 = vunpack.c.l.bf16 %v2010_v29  ;;  %v1748_v42 = vunpack.c.l.bf16 %v1986_v30  ;;  %v1841_v46 = vunpack.c.h.bf16 %v2009_v40  ;;  %v1840_v53 = vunpack.c.l.bf16 %v2009_v40 }
  0x8f   :  { %v1744_v54 = vunpack.c.l.bf16 %v1985_v41  ;;  %v1796_v30 = vunpack.c.l.bf16 %v1998_v17 }
  0x91   :  { %974 = vmatpush2.bf16.msra.mxu0 %v1689_v47  ;;  %1015 = vmatpush2.bf16.msra.mxu1 %v1691_v48  ;;  %v1745_v47 = vunpack.c.h.bf16 %v1985_v41  ;;  %v1992_v48 = vld [vmem:[#allocation5 + $0x58] sm:$0xff]  }
  0x92   :  { %975 = vmatprep.subr.bf16.mxu0 %v1682_v49  ;;  %1016 = vmatprep.subr.bf16.mxu1 %v1684_v50  ;;  %v1809_v49 = vunpack.c.h.bf16 %v2001_v43  ;;  %v1776_v50 = vunpack.c.l.bf16 %v1993_v37  ;;  %v1772_v63 = vunpack.c.l.bf16 %v1992_v48 }
  0x95   :  { %976 = vmatpush2.bf16.msra.mxu0 %v1681_v55  ;;  %1017 = vmatpush2.bf16.msra.mxu1 %v1683_v56  ;;  %v2000_v55 = vld [vmem:[#allocation5 + $0x98] sm:$0xff]   ;;  %v1808_v56 = vunpack.c.l.bf16 %v2001_v43 }
  0x96   :  { %977 = vmatprep.subr.bf16.mxu0 %v1674_v58  ;;  %1018 = vmatprep.subr.bf16.mxu1 %v1676_v59  ;;  %v1773_v58 = vunpack.c.h.bf16 %v1992_v48  ;;  %v1837_v59 = vunpack.c.h.bf16 %v2008_v51  ;;  %v1805_v62 = vunpack.c.h.bf16 %v2000_v55  ;;  %v1804_v5 = vunpack.c.l.bf16 %v2000_v55 }
  0x99   :  { %978 = vmatpush2.bf16.msra.mxu0 %v1673_v0  ;;  %1019 = vmatpush2.bf16.msra.mxu1 %v1675_v1  ;;  %v2007_v0 = vld [vmem:[#allocation5 + $0xd0] sm:$0xff]  }
  0x9a   :  { %979 = vmatprep.subr.bf16.mxu0 %v1666_v2  ;;  %1020 = vmatprep.subr.bf16.mxu1 %v1668_v3  ;;  %v1983_v1 = vld [vmem:[#allocation5 + $0x10] sm:$0xff]   ;;  %v1836_v2 = vunpack.c.l.bf16 %v2008_v51  ;;  %v1740_v3 = vunpack.c.l.bf16 %v1984_v52 }
  0x9d   :  { %980 = vmatpush2.bf16.msra.mxu0 %v1665_v6  ;;  %1021 = vmatpush2.bf16.msra.mxu1 %v1667_v7  ;;  %v1769_v6 = vunpack.c.h.bf16 %v1991_v61  ;;  %v1833_v7 = vunpack.c.h.bf16 %v2007_v0  ;;  %v2036_v61 = vld [vmem:[#allocation5 + $0x1b8] sm:$0xff]  }
  0x9e   :  { %2045 = vmatprep.subr.mxu0 %v1789_v8  ;;  %2080 = vmatprep.subr.mxu1 %v1853_v10  ;;  %v1737_v8 = vunpack.c.h.bf16 %v1983_v1  ;;  %v1801_v10 = vunpack.c.h.bf16 %v1999_v4  ;;  %v2027_v4 = vld [vmem:[#allocation5 + $0x170] sm:$0xff]  }
  0xa0   :  { %982 = vmatmul.mubr.bf16.vlgmr.msra.gmra.mxu0 %v2287_v12  ;;  %1023 = vmatmul.mubr.bf16.vlgmr.msra.gmra.mxu1 %v2287_v12  ;;  %v1845_v12 = vunpack.c.h.bf16 %v2010_v29  ;;  %v1997_v29 = vld [vmem:[#allocation5 + $0x80] sm:$0xff]  }
  0xa1   :  { %2046 = vmatpush3.msra.mxu0 %v1757_v13  ;;  %2081 = vmatpush3.msra.mxu1 %v1821_v15  ;;  %v2006_v13 = vld [vmem:[#allocation5 + $0xc8] sm:$0xff]   ;;  %v1832_v15 = vunpack.c.l.bf16 %v2007_v0 }
  0xa2   :  { %2047 = vmatprep.subr.mxu0 %v1788_v16  ;;  %2082 = vmatprep.subr.mxu1 %v1852_v19  ;;  %v1736_v16 = vunpack.c.l.bf16 %v1983_v1  ;;  %v1765_v19 = vunpack.c.h.bf16 %v1990_v9 }
  0xa3   :  { %2048 = vmatpush3.msra.mxu0 %v1756_v20  ;;  %2083 = vmatpush3.msra.mxu1 %v1820_v22  ;;  %v1829_v20 = vunpack.c.h.bf16 %v2006_v13  ;;  %v1989_v22 = vld [vmem:[#allocation5 + $0x40] sm:$0xff]  }
  0xa4   :  { %2049 = vmatprep.subr.mxu0 %v1785_v23  ;;  %2084 = vmatprep.subr.mxu1 %v1849_v24  ;;  %v1797_v23 = vunpack.c.h.bf16 %v1998_v17  ;;  %v1764_v24 = vunpack.c.l.bf16 %v1990_v9  ;;  %v1948_v17 = vunpack.c.l.bf16 %v2036_v61 }
  0xa5   :  { %2050 = vmatpush3.msra.mxu0 %v1753_v25  ;;  %2085 = vmatpush3.msra.mxu1 %v1817_v27  ;;  %v2005_v25 = vld [vmem:[#allocation5 + $0xc0] sm:$0xff]   ;;  %v1828_v27 = vunpack.c.l.bf16 %v2006_v13 }
  0xa6   :  { %2051 = vmatprep.subr.mxu0 %v1784_v28  ;;  %2086 = vmatprep.subr.mxu1 %v1848_v31  ;;  %v1732_v28 = vunpack.c.l.bf16 %v1982_v14  ;;  %v1761_v31 = vunpack.c.h.bf16 %v1989_v22  ;;  %v1824_v37 = vunpack.c.l.bf16 %v2005_v25 }
  0xa7   :  { %2052 = vmatpush3.msra.mxu0 %v1752_v32  ;;  %2087 = vmatpush3.msra.mxu1 %v1816_v34  ;;  %v1825_v32 = vunpack.c.h.bf16 %v2005_v25  ;;  %v2295_v34 = vld [vmem:[#allocation5 + $0x178] sm:$0xff]   ;;  %v2018_v25 = vld [vmem:[#allocation5 + $0x128] sm:$0xff]  }
  0xa8   :  { %2053 = vmatprep.subr.mxu0 %v1781_v35  ;;  %2088 = vmatprep.subr.mxu1 %v1845_v12  ;;  %v1793_v35 = vunpack.c.h.bf16 %v1997_v29  ;;  %v1760_v12 = vunpack.c.l.bf16 %v1989_v22  ;;  %v1917_v40 = vunpack.c.h.bf16 %v2295_v34  ;;  %v1916_v9 = vunpack.c.l.bf16 %v2295_v34 }
  0xa9   :  { %2054 = vmatpush3.msra.mxu0 %v1749_v36  ;;  %2089 = vmatpush3.msra.mxu1 %v1813_v38  ;;  %v2297_v36 = vld [vmem:[#allocation5 + $0x1f8] sm:$0xff]   ;;  %v1728_v38 = vunpack.c.l.bf16 %v1727_v26 }
  0xaa   :  { %2055 = vmatprep.subr.mxu0 %v1780_v39  ;;  %2090 = vmatprep.subr.mxu1 %v1844_v57  ;;  %v1792_v39 = vunpack.c.l.bf16 %v1997_v29  ;;  %v1981_v41 = vunpack.c.h.bf16 %v2297_v36  ;;  %v187_v57 = vlaneseq  ;;  %v1980_v14 = vunpack.c.l.bf16 %v2297_v36  ;;  %v2017_v36 = vld [vmem:[#allocation5 + $0x120] sm:$0xff]  }
  0xab   :  { %2056 = vmatpush3.msra.mxu0 %v1748_v42  ;;  %2091 = vmatpush3.msra.mxu1 %v1812_v44 }
  0xac   :  { %2057 = vmatprep.subr.mxu0 %v1777_v45  ;;  %2092 = vmatprep.subr.mxu1 %v1841_v46  ;;  %v2301_v42 = vshrl.u32 %v187_v57, 7  ;;  %v2308_v45 = vld [vmem:[%s2334_s2] sm:$0xff] }
  0xad   :  { %2058 = vmatpush3.msra.mxu0 %v1745_v47  ;;  %2093 = vmatpush3.msra.mxu1 %v1809_v49 }
  0xae   :  { %2059 = vmatprep.subr.mxu0 %v1776_v50  ;;  %2094 = vmatprep.subr.mxu1 %v1840_v53  ;;  %v189_v43 = vsub.s32 0, %v2301_v42  ;;  %v197_v44 = vsub.s32 2, %v2301_v42  ;;  %v193_v46 = vsub.s32 1, %v2301_v42  ;;  %v201_v47 = vsub.s32 3, %v2301_v42 }
  0xaf   :  { %2060 = vmatpush3.msra.mxu0 %v1744_v54  ;;  %2095 = vmatpush3.msra.mxu1 %v1808_v56 }
  0xb0   :  { %2061 = vmatprep.subr.mxu0 %v1773_v58  ;;  %2096 = vmatprep.subr.mxu1 %v1837_v59  ;;  %v190_v48 = vrot.slane %v2308_v45, %v189_v43  ;;  %v198_v49 = vrot.slane %v2308_v45, %v197_v44  ;;  %v194_v50 = vrot.slane %v2308_v45, %v193_v46  ;;  %v2020_v58 = vld [vmem:[#allocation5 + $0x138] sm:$0xff]   ;;  %v1873_v43 = vunpack.c.h.bf16 %v2017_v36 }
  0xb1   :  { %2062 = vmatpush3.msra.mxu0 %v1741_v60  ;;  %2097 = vmatpush3.msra.mxu1 %v1805_v62  ;;  %v202_v52 = vrot.slane %v2308_v45, %v201_v47  ;;  %v2024_v44 = vld [vmem:[#allocation5 + $0x158] sm:$0xff]  }
  0xb2   :  { %2063 = vmatprep.subr.mxu0 %v1772_v63  ;;  %2098 = vmatprep.subr.mxu1 %v1836_v2 }
  0xb3   :  { %2064 = vmatpush3.msra.mxu0 %v1740_v3  ;;  %2099 = vmatpush3.msra.mxu1 %v1804_v5  ;;  %v1885_v3 = vunpack.c.h.bf16 %v2020_v58 }
  0xb4   :  { %2065 = vmatprep.subr.mxu0 %v1769_v6  ;;  %2100 = vmatprep.subr.mxu1 %v1833_v7 }
  0xb5   :  { %2066 = vmatpush3.msra.mxu0 %v1737_v8  ;;  %2101 = vmatpush3.msra.mxu1 %v1801_v10  ;;  %v1949_v8 = vunpack.c.h.bf16 %v2036_v61  ;;  %v2043_v10 = vld [vmem:[#allocation5 + $0x1f0] sm:$0xff]  }
  0xb6   :  { %2067 = vmatprep.subr.mxu0 %v1768_v11  ;;  %2102 = vmatprep.subr.mxu1 %v1832_v15  ;;  %v2019_v11 = vld [vmem:[#allocation5 + $0x130] sm:$0xff]   ;;  %v1884_v15 = vunpack.c.l.bf16 %v2020_v58  ;;  %v1976_v26 = vunpack.c.l.bf16 %v2043_v10 }
  0xb7   :  { %2068 = vmatpush3.msra.mxu0 %v1736_v16  ;;  %2103 = vmatpush3.msra.mxu1 %v1800_v18  ;;  %v2035_v16 = vld [vmem:[#allocation5 + $0x1b0] sm:$0xff]   ;;  %v1913_v18 = vunpack.c.h.bf16 %v2027_v4 }
  0xb8   :  { %2069 = vmatprep.subr.mxu0 %v1765_v19  ;;  %2104 = vmatprep.subr.mxu1 %v1829_v20  ;;  %v1977_v19 = vunpack.c.h.bf16 %v2043_v10  ;;  %v1881_v20 = vunpack.c.h.bf16 %v2019_v11  ;;  %v1945_v22 = vunpack.c.h.bf16 %v2035_v16  ;;  %v1944_v29 = vunpack.c.l.bf16 %v2035_v16  ;;  %v2023_v58 = vld [vmem:[#allocation5 + $0x150] sm:$0xff]   ;;  %v2014_v10 = vld [vmem:[#allocation5 + $0x108] sm:$0xff]  }
  0xb9   :  { %2070 = vmatpush3.msra.mxu0 %v1733_v21  ;;  %2105 = vmatpush3.msra.mxu1 %v1797_v23  ;;  %v2026_v21 = vld [vmem:[#allocation5 + $0x168] sm:$0xff]   ;;  %v1912_v23 = vunpack.c.l.bf16 %v2027_v4  ;;  %v2039_v61 = vld [vmem:[#allocation5 + $0x1d0] sm:$0xff]  }
  0xba   :  { %2071 = vmatprep.subr.mxu0 %v1764_v24  ;;  %2106 = vmatprep.subr.mxu1 %v1828_v27  ;;  %v2042_v24 = vld [vmem:[#allocation5 + $0x1e8] sm:$0xff]   ;;  %v1880_v27 = vunpack.c.l.bf16 %v2019_v11  ;;  %v1961_v4 = vunpack.c.h.bf16 %v2039_v61  ;;  %v1960_v11 = vunpack.c.l.bf16 %v2039_v61 }
  0xbb   :  { %2072 = vmatpush3.msra.mxu0 %v1732_v28  ;;  %2107 = vmatpush3.msra.mxu1 %v1796_v30  ;;  %v2034_v28 = vld [vmem:[#allocation5 + $0x1a8] sm:$0xff]   ;;  %v1909_v30 = vunpack.c.h.bf16 %v2026_v21 }
  0xbc   :  { %2073 = vmatprep.subr.mxu0 %v1761_v31  ;;  %2108 = vmatprep.subr.mxu1 %v1825_v32  ;;  %v1973_v31 = vunpack.c.h.bf16 %v2042_v24  ;;  %v1877_v32 = vunpack.c.h.bf16 %v2018_v25  ;;  %v1941_v34 = vunpack.c.h.bf16 %v2034_v28 }
  0xbd   :  { %2074 = vmatpush3.msra.mxu0 %v1729_v33  ;;  %2109 = vmatpush3.msra.mxu1 %v1793_v35  ;;  %v2025_v33 = vld [vmem:[#allocation5 + $0x160] sm:$0xff]   ;;  %v1908_v35 = vunpack.c.l.bf16 %v2026_v21 }
  0xbe   :  { %2075 = vmatprep.subr.mxu0 %v1760_v12  ;;  %2110 = vmatprep.subr.mxu1 %v1824_v37  ;;  %v2041_v12 = vld [vmem:[#allocation5 + $0x1e0] sm:$0xff]   ;;  %v1972_v37 = vunpack.c.l.bf16 %v2042_v24  ;;  %v1904_v47 = vunpack.c.l.bf16 %v2025_v33 }
  0xbf   :  { %2076 = vmatpush3.msra.mxu0 %v1728_v38  ;;  %2111 = vmatpush3.msra.mxu1 %v1792_v39  ;;  %v1876_v38 = vunpack.c.l.bf16 %v2018_v25  ;;  %v2033_v39 = vld [vmem:[#allocation5 + $0x1a0] sm:$0xff]   ;;  %v1969_v57 = vunpack.c.h.bf16 %v2041_v12  ;;  %v1860_v25 = vunpack.c.l.bf16 %v2014_v10 }
  0xc0   :  { %2115 = vmatprep.subr.mxu0 %v1917_v40  ;;  %2150 = vmatprep.subr.mxu1 %v1981_v41  ;;  %v1940_v40 = vunpack.c.l.bf16 %v2034_v28  ;;  %v1905_v41 = vunpack.c.h.bf16 %v2025_v33  ;;  %v1937_v46 = vunpack.c.h.bf16 %v2033_v39 }
 0x120   :  { %v901_v51 = vpop.f32.mrf.mxu0  ;;  %v942_v53 = vpop.f32.mrf.mxu1 }
 0x121   :  { %v902_v54 = vadd.f32 %v901_v51, %v190_v48  ;;  %v943_v55 = vadd.f32 %v942_v53, %v198_v49  ;;  %v2040_v48 = vld [vmem:[#allocation5 + $0x1d8] sm:$0xff]   ;;  %v1872_v51 = vunpack.c.l.bf16 %v2017_v36  ;;  %v1936_v53 = vunpack.c.l.bf16 %v2033_v39 }
 0x122   :  { %v903_v56 = vpop.f32.mrf.mxu0  ;;  %v944_v60 = vpop.f32.mrf.mxu1  ;;  %v2016_v49 = vld [vmem:[#allocation5 + $0x118] sm:$0xff]   ;;  %v213_v36 = vsub.s32 6, %v2301_v42 }
 0x123   :  { %v904_v59 = vadd.f32 %v903_v56, %v194_v50  ;;  %v945_v62 = vadd.f32 %v944_v60, %v202_v52  ;;  %v1033_v0 = vmax.f32 %v943_v55, 0.0  ;;  %v1031_v5 = vmax.f32 %v902_v54, 0.0  ;;  %v2032_v52 = vld [vmem:[#allocation5 + $0x198] sm:$0xff]  }
 0x124   :  { %v905_v63 = vpop.f32.mrf.mxu0  ;;  %v946_v2 = vpop.f32.mrf.mxu1  ;;  %v1968_v50 = vunpack.c.l.bf16 %v2041_v12  ;;  %v1901_v54 = vunpack.c.h.bf16 %v2024_v44  ;;  %v1965_v55 = vunpack.c.h.bf16 %v2040_v48  ;;  %v1869_v56 = vunpack.c.h.bf16 %v2016_v49 }
 0x125   :  { %v1032_v1 = vmax.f32 %v904_v59, 0.0  ;;  %v1034_v6 = vmax.f32 %v945_v62, 0.0  ;;  %v1933_v59 = vunpack.c.h.bf16 %v2032_v52  ;;  %v1900_v60 = vunpack.c.l.bf16 %v2024_v44  ;;  %v2015_v62 = vld [vmem:[#allocation5 + $0x110] sm:$0xff]  }
 0x126   :  { %v906_v7 = vpop.f32.mrf.mxu0  ;;  %v947_v13 = vpop.f32.mrf.mxu1  ;;  %v1964_v63 = vunpack.c.l.bf16 %v2040_v48  ;;  %v1932_v2 = vunpack.c.l.bf16 %v2032_v52  ;;  %v205_v12 = vsub.s32 4, %v2301_v42 }
 0x127   :  { %1360 = vmatprep.mubr.f32.mxu0 %v1032_v1  ;;  %1430 = vmatprep.mubr.f32.mxu1 %v1034_v6  ;;  %v2031_v1 = vld [vmem:[#allocation5 + $0x190] sm:$0xff]   ;;  %v2022_v6 = vld [vmem:[#allocation5 + $0x148] sm:$0xff]   ;;  %v1864_v13 = vunpack.c.l.bf16 %v2015_v62 }
 0x128   :  { %1361 = vmatmul.mubr.f32.vlgmr.msra.gmra.mxu0 %v1031_v5  ;;  %1431 = vmatmul.mubr.f32.vlgmr.msra.gmra.mxu1 %v1033_v0  ;;  %v1868_v0 = vunpack.c.l.bf16 %v2016_v49  ;;  %v1865_v5 = vunpack.c.h.bf16 %v2015_v62  ;;  %v1929_v7 = vunpack.c.h.bf16 %v2031_v1  ;;  %v1893_v16 = vunpack.c.h.bf16 %v2022_v6 }
 0x129   :  { %2116 = vmatpush3.msra.mxu0 %v1885_v3  ;;  %2151 = vmatpush3.msra.mxu1 %v1949_v8  ;;  %v1897_v3 = vunpack.c.h.bf16 %v2023_v58  ;;  %v1896_v8 = vunpack.c.l.bf16 %v2023_v58  ;;  %v1892_v21 = vunpack.c.l.bf16 %v2022_v6  ;;  %v206_v39 = vrot.slane %v2308_v45, %v205_v12 }
 0x12a   :  { %2117 = vmatprep.subr.mxu0 %v1916_v9  ;;  %2152 = vmatprep.subr.mxu1 %v1980_v14  ;;  %v2038_v9 = vld [vmem:[#allocation5 + $0x1c8] sm:$0xff]  }
 0x12b   :  { %2118 = vmatpush3.msra.mxu0 %v1884_v15  ;;  %2153 = vmatpush3.msra.mxu1 %v1948_v17  ;;  %v2030_v14 = vld [vmem:[#allocation5 + $0x188] sm:$0xff]   ;;  %v1928_v15 = vunpack.c.l.bf16 %v2031_v1  ;;  %v1957_v17 = vunpack.c.h.bf16 %v2038_v9  ;;  %v1956_v24 = vunpack.c.l.bf16 %v2038_v9  ;;  %v1725_v9 = vld [vmem:[%s2336_s4] ss:$0 sm:$0xff] }
 0x12c   :  { %2119 = vmatprep.subr.mxu0 %v1913_v18  ;;  %2154 = vmatprep.subr.mxu1 %v1977_v19  ;;  %v1861_v18 = vunpack.c.h.bf16 %v2014_v10  ;;  %v2021_v19 = vld [vmem:[#allocation5 + $0x140] sm:$0xff]  }
 0x12d   :  { %2120 = vmatpush3.msra.mxu0 %v1881_v20  ;;  %2155 = vmatpush3.msra.mxu1 %v1945_v22  ;;  %v1925_v20 = vunpack.c.h.bf16 %v2030_v14  ;;  %v2037_v22 = vld [vmem:[#allocation5 + $0x1c0] sm:$0xff]   ;;  %v1889_v28 = vunpack.c.h.bf16 %v2021_v19 }
 0x12e   :  { %2121 = vmatprep.subr.mxu0 %v1912_v23  ;;  %2156 = vmatprep.subr.mxu1 %v1976_v26  ;;  %v2013_v23 = vld [vmem:[#allocation5 + $0x100] sm:$0xff]   ;;  %v1952_v33 = vunpack.c.l.bf16 %v2037_v22 }
 0x12f   :  { %2122 = vmatpush3.msra.mxu0 %v1880_v27  ;;  %2157 = vmatpush3.msra.mxu1 %v1944_v29  ;;  %v2029_v26 = vld [vmem:[#allocation5 + $0x180] sm:$0xff]   ;;  %v1924_v27 = vunpack.c.l.bf16 %v2030_v14  ;;  %v1953_v29 = vunpack.c.h.bf16 %v2037_v22 }
 0x130   :  { %2123 = vmatprep.subr.mxu0 %v1909_v30  ;;  %2158 = vmatprep.subr.mxu1 %v1973_v31  ;;  %v1857_v30 = vunpack.c.h.bf16 %v2013_v23  ;;  %v1921_v31 = vunpack.c.h.bf16 %v2029_v26 }
 0x131   :  { %2124 = vmatpush3.msra.mxu0 %v1877_v32  ;;  %2159 = vmatpush3.msra.mxu1 %v1941_v34  ;;  %v1888_v32 = vunpack.c.l.bf16 %v2021_v19  ;;  %v1856_v34 = vunpack.c.l.bf16 %v2013_v23 }
 0x132   :  { %2125 = vmatprep.subr.mxu0 %v1908_v35  ;;  %2160 = vmatprep.subr.mxu1 %v1972_v37  ;;  %v1920_v35 = vunpack.c.l.bf16 %v2029_v26  ;;  %v209_v37 = vsub.s32 5, %v2301_v42 }
 0x133   :  { %2126 = vmatpush3.msra.mxu0 %v1876_v38  ;;  %2161 = vmatpush3.msra.mxu1 %v1940_v40  ;;  %v217_v38 = vsub.s32 7, %v2301_v42  ;;  %v214_v40 = vrot.slane %v2308_v45, %v213_v36 }
 0x134   :  { %2127 = vmatprep.subr.mxu0 %v1905_v41  ;;  %2162 = vmatprep.subr.mxu1 %v1969_v57  ;;  %v210_v41 = vrot.slane %v2308_v45, %v209_v37 }
 0x135   :  { %2128 = vmatpush3.msra.mxu0 %v1873_v43  ;;  %2163 = vmatpush3.msra.mxu1 %v1937_v46  ;;  %v218_v43 = vrot.slane %v2308_v45, %v217_v38 }
 0x136   :  { %2129 = vmatprep.subr.mxu0 %v1904_v47  ;;  %2164 = vmatprep.subr.mxu1 %v1968_v50 }
 0x137   :  { %2130 = vmatpush3.msra.mxu0 %v1872_v51  ;;  %2165 = vmatpush3.msra.mxu1 %v1936_v53 }
 0x138   :  { %2131 = vmatprep.subr.mxu0 %v1901_v54  ;;  %2166 = vmatprep.subr.mxu1 %v1965_v55 }
 0x139   :  { %2132 = vmatpush3.msra.mxu0 %v1869_v56  ;;  %2167 = vmatpush3.msra.mxu1 %v1933_v59 }
 0x13a   :  { %2133 = vmatprep.subr.mxu0 %v1900_v60  ;;  %2168 = vmatprep.subr.mxu1 %v1964_v63 }
 0x13b   :  { %2134 = vmatpush3.msra.mxu0 %v1868_v0  ;;  %2169 = vmatpush3.msra.mxu1 %v1932_v2 }
 0x13c   :  { %2135 = vmatprep.subr.mxu0 %v1897_v3  ;;  %2170 = vmatprep.subr.mxu1 %v1961_v4 }
 0x13d   :  { %2136 = vmatpush3.msra.mxu0 %v1865_v5  ;;  %2171 = vmatpush3.msra.mxu1 %v1929_v7 }
 0x13e   :  { %2137 = vmatprep.subr.mxu0 %v1896_v8  ;;  %2172 = vmatprep.subr.mxu1 %v1960_v11 }
 0x13f   :  { %2138 = vmatpush3.msra.mxu0 %v1864_v13  ;;  %2173 = vmatpush3.msra.mxu1 %v1928_v15 }
 0x140   :  { %2139 = vmatprep.subr.mxu0 %v1893_v16  ;;  %2174 = vmatprep.subr.mxu1 %v1957_v17 }
 0x141   :  { %2140 = vmatpush3.msra.mxu0 %v1861_v18  ;;  %2175 = vmatpush3.msra.mxu1 %v1925_v20 }
 0x142   :  { %2141 = vmatprep.subr.mxu0 %v1892_v21  ;;  %2176 = vmatprep.subr.mxu1 %v1956_v24 }
 0x143   :  { %2142 = vmatpush3.msra.mxu0 %v1860_v25  ;;  %2177 = vmatpush3.msra.mxu1 %v1924_v27 }
 0x144   :  { %2143 = vmatprep.subr.mxu0 %v1889_v28  ;;  %2178 = vmatprep.subr.mxu1 %v1953_v29 }
 0x145   :  { %2144 = vmatpush3.msra.mxu0 %v1857_v30  ;;  %2179 = vmatpush3.msra.mxu1 %v1921_v31 }
 0x146   :  { %2145 = vmatprep.subr.mxu0 %v1888_v32  ;;  %2180 = vmatprep.subr.mxu1 %v1952_v33 }
 0x147   :  { %2146 = vmatpush3.msra.mxu0 %v1856_v34  ;;  %2181 = vmatpush3.msra.mxu1 %v1920_v35 }
 0x160   :  { %v983_v57 = vpop.f32.mrf.mxu0  ;;  %v1024_v44 = vpop.f32.mrf.mxu1 }
 0x161   :  { %v984_v46 = vadd.f32 %v983_v57, %v206_v39  ;;  %v1025_v47 = vadd.f32 %v1024_v44, %v214_v40 }
 0x162   :  { %v985_v48 = vpop.f32.mrf.mxu0  ;;  %v1026_v50 = vpop.f32.mrf.mxu1 }
 0x163   :  { %v986_v49 = vadd.f32 %v985_v48, %v210_v41  ;;  %v1027_v51 = vadd.f32 %v1026_v50, %v218_v43  ;;  %v1037_v53 = vmax.f32 %v1025_v47, 0.0  ;;  %v1035_v55 = vmax.f32 %v984_v46, 0.0 }
 0x164   :  { %v987_v52 = vpop.f32.mrf.mxu0  ;;  %v1028_v42 = vpop.f32.mrf.mxu1 }
 0x165   :  { %v1036_v54 = vmax.f32 %v986_v49, 0.0  ;;  %v1038_v56 = vmax.f32 %v1027_v51, 0.0 }
 0x166   :  { %v988_v58 = vpop.f32.mrf.mxu0  ;;  %v1029_v59 = vpop.f32.mrf.mxu1 }
 0x167   :  { %1500 = vmatprep.mubr.f32.mxu0 %v1036_v54  ;;  %1570 = vmatprep.mubr.f32.mxu1 %v1038_v56 }
 0x168   :  { %1501 = vmatmul.mubr.f32.vlgmr.msra.gmra.mxu0 %v1035_v55  ;;  %1571 = vmatmul.mubr.f32.vlgmr.msra.gmra.mxu1 %v1037_v53 }
 0x1e8   :  { %v2077_v45 = vpop.f32.mrf.mxu0  ;;  %v2112_v60 = vpop.f32.mrf.mxu1 }
 0x1ea   :  { %v2078_v61 = vpop.f32.mrf.mxu0  ;;  %v2113_v62 = vpop.f32.mrf.mxu1 }
 0x1eb   :  { %v2079_v63 = vadd.f32 %v2078_v61, %v2077_v45  ;;  %v2114_v0 = vadd.f32 %v2113_v62, %v2112_v60 }
 0x1ed   :  { %v1433_v4 = vadd.f32 %v2114_v0, %v2079_v63 }
 0x228   :  { %v2147_v1 = vpop.f32.mrf.mxu0  ;;  %v2182_v2 = vpop.f32.mrf.mxu1 }
 0x22a   :  { %v2148_v3 = vpop.f32.mrf.mxu0  ;;  %v2183_v6 = vpop.f32.mrf.mxu1 }
 0x22b   :  { %v2149_v5 = vadd.f32 %v2148_v3, %v2147_v1  ;;  %v2184_v8 = vadd.f32 %v2183_v6, %v2182_v2 }
 0x22d   :  { %v1503_v7 = vadd.f32 %v2149_v5, %v1433_v4 }
 0x22f   :  { %v1573_v10 = vadd.f32 %v2184_v8, %v1503_v7 }
 0x231   :  { %v1589_v11 = vadd.f32 %v1725_v9, %v1573_v10 }
 0x233   :  { %1590 = vst [vmem:[%s2337_s5] sm:$0xff] %v1589_v11 }
 0x234   :  { %1595 = vsyncpa [#allocation4], 1 }
 0x235   :  { %1596 = vsyncpa [#allocation6], 1 }

</bundles_post_ra>
